<compile_context>
chip_gen: v7x
topology: tpu7x:2x2x1
jax: 0.10.0
libtpu: 0.0.40
codegen_flags: <defaults>
</compile_context>

<pallas_src>
import jax
import jax.numpy as jnp
from jax.experimental import pallas as pl
from jax.experimental.pallas import tpu as pltpu


def _round_up(x: int, m: int) -> int:
    return ((x + m - 1) // m) * m


def _gemm_bias_kernel(w_ref, a_ref, b_ref, o_ref):
    """Single reduction step: o = W @ A^T + bias  (one MXU pass, no scratch)."""
    o_ref[...] = (
        jnp.dot(w_ref[...], a_ref[...], preferred_element_type=jnp.float32)
        + b_ref[...]
    ).astype(o_ref.dtype)


def _gemm_bias_acc_kernel(w_ref, a_ref, b_ref, o_ref, acc_ref):
    """General case: reduction over the trailing k grid axis with an f32 accumulator."""
    k = pl.program_id(1)

    @pl.when(k == 0)
    def _():
        acc_ref[...] = jnp.zeros_like(acc_ref)

    acc_ref[...] += jnp.dot(w_ref[...], a_ref[...],
                            preferred_element_type=jnp.float32)

    @pl.when(k == pl.num_programs(1) - 1)
    def _():
        o_ref[...] = (acc_ref[...] + b_ref[...]).astype(o_ref.dtype)


def _conv_gemm(w_p: jax.Array, a_t: jax.Array, b_p: jax.Array, tk: int,
               tm_target: int = 2048) -> jax.Array:
    """out[Cp, M] = w_p[Cp, Kp] @ a_t[Kp, M] + b_p[Cp, 1].

    w_p/a_t are bf16 (Kp a multiple of tk, Cp a multiple of 8); out is f32.
    M need not be a multiple of TM: Pallas masks the edge block on load/store.
    """
    Cp, Kp = w_p.shape
    Kp2, M = a_t.shape
    assert Kp == Kp2 and Kp % tk == 0 and Cp % 8 == 0

    # Large M tile => per-grid-step HBM bytes dominate the ~0.35us step overhead.
    TM = tm_target if M > tm_target else _round_up(M, 128)
    grid_m = pl.cdiv(M, TM)
    grid_k = Kp // tk
    out_shape = jax.ShapeDtypeStruct((Cp, M), jnp.float32)

    if grid_k == 1:
        return pl.pallas_call(
            _gemm_bias_kernel,
            out_shape=out_shape,
            grid_spec=pltpu.PrefetchScalarGridSpec(
                num_scalar_prefetch=0,
                grid=(grid_m,),
                in_specs=[
                    pl.BlockSpec((Cp, Kp), lambda j: (0, 0)),   # W: resident
                    pl.BlockSpec((Kp, TM), lambda j: (0, j)),   # A^T: streams over M
                    pl.BlockSpec((Cp, 1), lambda j: (0, 0)),    # bias column
                ],
                out_specs=pl.BlockSpec((Cp, TM), lambda j: (0, j)),
            ),
            compiler_params=pltpu.CompilerParams(
                dimension_semantics=("parallel",)),
        )(w_p, a_t, b_p)

    return pl.pallas_call(
        _gemm_bias_acc_kernel,
        out_shape=out_shape,
        grid_spec=pltpu.PrefetchScalarGridSpec(
            num_scalar_prefetch=0,
            grid=(grid_m, grid_k),
            in_specs=[
                pl.BlockSpec((Cp, tk), lambda j, k: (0, k)),
                pl.BlockSpec((tk, TM), lambda j, k: (k, j)),
                pl.BlockSpec((Cp, 1), lambda j, k: (0, 0)),
            ],
            out_specs=pl.BlockSpec((Cp, TM), lambda j, k: (0, j)),
            scratch_shapes=[pltpu.VMEM((Cp, TM), jnp.float32)],
        ),
        compiler_params=pltpu.CompilerParams(
            dimension_semantics=("parallel", "arbitrary")),
    )(w_p, a_t, b_p)


@jax.jit
def spatial_conv_forward(data: jax.Array, weight: jax.Array, bias: jax.Array) -> jax.Array:
    """Equivalent of SpatialConv.forward.

    data:   [B, n_ver, kernel_dim, f_in, X, Y, Z]
    weight: [f_out, f_in, kx, ky, kz]   (torch Conv3d layout)
    bias:   [f_out]
    """
    B, V, Kd, Cin, X, Y, Z = data.shape
    Cout = int(weight.shape[0])
    kx, ky, kz = int(weight.shape[2]), int(weight.shape[3]), int(weight.shape[4])
    OX, OY, OZ = X - kx + 1, Y - ky + 1, Z - kz + 1
    N = B * V * Kd
    M = N * OX * OY * OZ
    K = Cin * kx * ky * kz

    Cp = _round_up(Cout, 8)
    TK = min(512, _round_up(K, 128))
    Kp = _round_up(K, TK)

    # One *input-sized* transpose so the (n, ox, oy, oz) "M" axes stay contiguous on the
    # last (lane-dense) axes of every shifted view; the kx*ky*kz-expanded array is then
    # built directly in its final (Kp, M) layout and never transposed again.  bf16 cast
    # happens before the expansion so all expanded-array traffic is half width.
    x = data.astype(jnp.bfloat16).reshape(N, Cin, X, Y, Z)
    x = x.transpose(1, 0, 2, 3, 4)                              # (Cin, N, X, Y, Z)

    # im2col^T: K index order = (dx, dy, dz, ci).  Zero rows pad K up to Kp inside the
    # same concatenate (single pass over the expanded data) so the MXU contraction over
    # the padding is exactly zero.
    cols = [x[:, :, dx:dx + OX, dy:dy + OY, dz:dz + OZ]
            for dx in range(kx) for dy in range(ky) for dz in range(kz)]
    if Kp > K:
        cols.append(jnp.zeros((Kp - K, N, OX, OY, OZ), jnp.bfloat16))
    a_t = jnp.concatenate(cols, axis=0).reshape(Kp, M)          # (Kp, M), M lane-dense

    # Weight flattened in the matching (dx, dy, dz, ci) reduction order; rows = Cout so
    # the kernel's output tile is (Cp, TM) -> dense stores (no 16x lane padding).
    w2d = weight.transpose(0, 2, 3, 4, 1).reshape(Cout, K).astype(jnp.bfloat16)
    w_p = jnp.pad(w2d, ((0, Cp - Cout), (0, Kp - K)))
    b_p = jnp.pad(bias.astype(jnp.float32), (0, Cp - Cout)).reshape(Cp, 1)

    out_t = _conv_gemm(w_p, a_t, b_p, TK)                       # (Cp, M) float32

    out = out_t[:Cout].reshape(Cout, N, OX, OY, OZ)
    out = out.transpose(1, 0, 2, 3, 4)                          # (N, Cout, OX, OY, OZ)
    return out.reshape(B, V, Kd, Cout, OX, OY, OZ).astype(data.dtype)


if __name__ == "__main__":
    key = jax.random.PRNGKey(0)
    k1, k2, k3 = jax.random.split(key, 3)

    # Small shapes consistent with the module's forward signature.
    batch, n_ver, kernel_dim = 2, 2, 2
    f_in, f_out = 4, 8
    X = Y = Z = 8
    ksize = (3, 3, 3)

    data = jax.random.normal(k1, (batch, n_ver, kernel_dim, f_in, X, Y, Z), jnp.float32)
    fan_in = f_in * ksize[0] * ksize[1] * ksize[2]
    weight = jax.random.normal(k2, (f_out, f_in) + ksize, jnp.float32) / jnp.sqrt(fan_in)
    bias = jax.random.normal(k3, (f_out,), jnp.float32) * 0.1

    out = spatial_conv_forward(data, weight, bias)
    out = jax.block_until_ready(out)

    # Reference: XLA 3-D convolution (same semantics as torch.nn.Conv3d, VALID padding).
    x5 = data.reshape(-1, f_in, X, Y, Z)
    ref = jax.lax.conv_general_dilated(
        x5, weight, window_strides=(1, 1, 1), padding="VALID",
        dimension_numbers=("NCDHW", "OIDHW", "NCDHW"),
        precision=jax.lax.Precision.HIGHEST)
    ref = ref + bias[None, :, None, None, None]
    OX, OY, OZ = X - ksize[0] + 1, Y - ksize[1] + 1, Z - ksize[2] + 1
    ref = ref.reshape(batch, n_ver, kernel_dim, f_out, OX, OY, OZ)

    assert out.shape == (batch, n_ver, kernel_dim, f_out, OX, OY, OZ), out.shape
    max_err = float(jnp.max(jnp.abs(out - ref)))
    assert jnp.allclose(out, ref, rtol=2e-2, atol=2e-2), f"mismatch vs reference: {max_err}"

    print("KERNEL_OK")
</pallas_src>

<mosaic_0001>
module attributes {stable_mosaic.version = 11 : i64} {
  func.func @_gemm_bias_kernel(%arg0: i32, %arg1: memref<8x128xbf16, #tpu.memory_space<vmem>>, %arg2: memref<128x1792xbf16, #tpu.memory_space<vmem>>, %arg3: memref<8x1xf32, #tpu.memory_space<vmem>>, %arg4: memref<8x1792xf32, #tpu.memory_space<vmem>>) attributes {dimension_semantics = [#tpu.dimension_semantics<parallel>], iteration_bounds = array<i64: 1>, scalar_prefetch = 0 : i64, scratch_operands = 0 : i64, tpu.core_type = #tpu.core_type<tc>, window_params = [{pipeline_mode = #tpu.pipeline_mode<synchronous>, transform_indices = @transform_0, window_bounds = array<i64: 8, 128>}, {transform_indices = @transform_1, window_bounds = array<i64: 128, 1792>}, {pipeline_mode = #tpu.pipeline_mode<synchronous>, transform_indices = @transform_2, window_bounds = array<i64: 8, 1>}, {transform_indices = @transform_3, window_bounds = array<i64: 8, 1792>}]} {
    %c0 = arith.constant 0 : index
    %c0_0 = arith.constant 0 : index
    %0 = vector.load %arg1[%c0, %c0_0] : memref<8x128xbf16, #tpu.memory_space<vmem>>, vector<8x128xbf16>
    %c0_1 = arith.constant 0 : index
    %c0_2 = arith.constant 0 : index
    %1 = vector.load %arg2[%c0_1, %c0_2] : memref<128x1792xbf16, #tpu.memory_space<vmem>>, vector<128x1792xbf16>
    %cst = arith.constant dense<0.000000e+00> : vector<8x1792xf32>
    %2 = tpu.matmul %0, %1, %cst {dimension_numbers = #tpu.dot_dimension_numbers<[1], [0], [0], [1], [0, 0, 1, 1], [], []>} : vector<8x128xbf16>, vector<128x1792xbf16>, vector<8x1792xf32> -> vector<8x1792xf32>
    %c0_3 = arith.constant 0 : index
    %c0_4 = arith.constant 0 : index
    %3 = vector.load %arg3[%c0_3, %c0_4] : memref<8x1xf32, #tpu.memory_space<vmem>>, vector<8x1xf32>
    %4 = vector.broadcast %3 : vector<8x1xf32> to vector<8x1792xf32>
    %5 = arith.addf %2, %4 : vector<8x1792xf32>
    %c0_5 = arith.constant 0 : index
    %c0_6 = arith.constant 0 : index
    %6 = vector.load %arg4[%c0_5, %c0_6] : memref<8x1792xf32, #tpu.memory_space<vmem>>, vector<8x1792xf32>
    tpu.vector_store %arg4[%c0_5, %c0_6], %5 {strides = array<i32>} : memref<8x1792xf32, #tpu.memory_space<vmem>>, vector<8x1792xf32>,
    return
  }
  func.func @transform_0(%arg0: i32) -> (i32, i32) {
    %c0_i32 = arith.constant 0 : i32
    %c0_i32_0 = arith.constant 0 : i32
    %c0_i32_1 = arith.constant 0 : i32
    return %c0_i32, %c0_i32_0 : i32, i32
  }
  func.func @transform_1(%arg0: i32) -> (i32, i32) {
    %c0_i32 = arith.constant 0 : i32
    %c0_i32_0 = arith.constant 0 : i32
    return %c0_i32, %arg0 : i32, i32
  }
  func.func @transform_2(%arg0: i32) -> (i32, i32) {
    %c0_i32 = arith.constant 0 : i32
    %c0_i32_0 = arith.constant 0 : i32
    %c0_i32_1 = arith.constant 0 : i32
    return %c0_i32, %c0_i32_0 : i32, i32
  }
  func.func @transform_3(%arg0: i32) -> (i32, i32) {
    %c0_i32 = arith.constant 0 : i32
    %c0_i32_0 = arith.constant 0 : i32
    return %c0_i32, %arg0 : i32, i32
  }
}

</mosaic_0001>

<bundles_post_ra>
// kernel: spatial_conv_forward.1
= control target key start
LH: loop header
LB: loop body
LE: loop exit
PB: predicated region body
PF: predicated region fallthrough
CT: control target
= control target key end

     0   :  { %v1281_v1 = vmov 0   ;;  %s1703_s1 = inlined_call_operand.vmem [shape: bf16[128,1728], index: 1, kind: input, shape index: {}]   ;;  %s1704_s0 = inlined_call_operand.vmem [shape: bf16[8,128], index: 0, kind: input, shape index: {}]   ;;  %s1705_s2 = inlined_call_operand.vmem [shape: f32[8,1], index: 2, kind: input, shape index: {}]   ;;  %s1706_s3 = inlined_call_operand.vmem [shape: f32[8,1728], index: 3, kind: output, shape index: {}]  }
   0x1   :  { %v1113_v0 = vld [vmem:[%s1703_s1 + $0x4] ss:$56 sps:$4 sm:$0xff]   ;;  %726 = vmatprep.mubr.bf16.mxu0 %v1281_v1  ;;  %767 = vmatprep.mubr.bf16.mxu1 %v1281_v1  ;;  %v1115_v2 = vld [vmem:[%s1703_s1] ss:$56 sps:$4 sm:$0xff]   ;;  %v1116_v3 = vld [vmem:[%s1703_s1 + $0x74] ss:$56 sps:$4 sm:$0xff]  }
   0x2   :  { %1112 = vset.pattern.permute.xlu0 %v1281_v1  ;;  %694 = vmatprep.subr.bf16.mxu0 %v1113_v0  ;;  %v1118_v4 = vld [vmem:[%s1703_s1 + $0x70] ss:$56 sps:$4 sm:$0xff]   ;;  %v1119_v5 = vld [vmem:[%s1703_s1 + $0xe4] ss:$56 sps:$4 sm:$0xff]   ;;  %v1121_v6 = vld [vmem:[%s1703_s1 + $0xe0] ss:$56 sps:$4 sm:$0xff]  }
   0x3   :  { %695 = vmatpush1.bf16.msra.mxu0 %v1115_v2  ;;  %v1122_v7 = vld [vmem:[%s1703_s1 + $0x154] ss:$56 sps:$4 sm:$0xff]   ;;  %v1124_v8 = vld [vmem:[%s1703_s1 + $0x150] ss:$56 sps:$4 sm:$0xff]   ;;  %v1125_v11 = vld [vmem:[%s1703_s1 + $0x1c4] ss:$56 sps:$4 sm:$0xff]  }
   0x4   :  { %696 = vmatprep.subr.bf16.mxu0 %v1116_v3  ;;  %v1137_v9 = vld [vmem:[%s1703_s1 + $0xc] ss:$56 sps:$4 sm:$0xff]   ;;  %v1139_v10 = vld [vmem:[%s1703_s1 + $0x8] ss:$56 sps:$4 sm:$0xff]   ;;  %v1143_v12 = vld [vmem:[%s1703_s1 + $0x7c] ss:$56 sps:$4 sm:$0xff]  }
   0x5   :  { %735 = vmatprep.subr.bf16.mxu1 %v1137_v9  ;;  %v1145_v13 = vld [vmem:[%s1703_s1 + $0x78] ss:$56 sps:$4 sm:$0xff]   ;;  %v1128_v15 = vld [vmem:[%s1703_s1 + $0x234] ss:$56 sps:$4 sm:$0xff]   ;;  %v1151_v18 = vld [vmem:[%s1703_s1 + $0xe8] ss:$56 sps:$4 sm:$0xff]  }
   0x6   :  { %736 = vmatpush1.bf16.msra.mxu1 %v1139_v10  ;;  %v1127_v14 = vld [vmem:[%s1703_s1 + $0x1c0] ss:$56 sps:$4 sm:$0xff]   ;;  %v1149_v16 = vld [vmem:[%s1703_s1 + $0xec] ss:$56 sps:$4 sm:$0xff]   ;;  %v1130_v17 = vld [vmem:[%s1703_s1 + $0x230] ss:$56 sps:$4 sm:$0xff]  }
   0x7   :  { %697 = vmatpush1.bf16.msra.mxu0 %v1118_v4  ;;  %737 = vmatprep.subr.bf16.mxu1 %v1143_v12  ;;  %v1155_v19 = vld [vmem:[%s1703_s1 + $0x15c] ss:$56 sps:$4 sm:$0xff]   ;;  %v1133_v21 = vld [vmem:[%s1703_s1 + $0x2a0] ss:$56 sps:$4 sm:$0xff]   ;;  %v1161_v23 = vld [vmem:[%s1703_s1 + $0x1cc] ss:$56 sps:$4 sm:$0xff]  }
   0x8   :  { %698 = vmatprep.subr.bf16.mxu0 %v1119_v5  ;;  %v1131_v20 = vld [vmem:[%s1703_s1 + $0x2a4] ss:$56 sps:$4 sm:$0xff]   ;;  %v1157_v22 = vld [vmem:[%s1703_s1 + $0x158] ss:$56 sps:$4 sm:$0xff]   ;;  %v1134_v24 = vld [vmem:[%s1703_s1 + $0x314] ss:$56 sps:$4 sm:$0xff]  }
   0x9   :  { %v1136_v25 = vld [vmem:[%s1703_s1 + $0x310] ss:$56 sps:$4 sm:$0xff]   ;;  %v1167_v27 = vld [vmem:[%s1703_s1 + $0x23c] ss:$56 sps:$4 sm:$0xff]   ;;  %v1392_v29 = vld [vmem:[%s1704_s0] sm:$0xf] }
   0xa   :  { %738 = vmatpush1.bf16.msra.mxu1 %v1145_v13  ;;  %v1163_v26 = vld [vmem:[%s1703_s1 + $0x1c8] ss:$56 sps:$4 sm:$0xff]   ;;  %v1142_v28 = vld [vmem:[%s1703_s1 + $0x14] ss:$56 sps:$4 sm:$0xff]   ;;  %v1169_v31 = vld [vmem:[%s1703_s1 + $0x238] ss:$56 sps:$4 sm:$0xff]  }
   0xb   :  { %699 = vmatpush1.bf16.msra.mxu0 %v1121_v6  ;;  %739 = vmatprep.subr.bf16.mxu1 %v1149_v16  ;;  %v1140_v30 = vld [vmem:[%s1703_s1 + $0x10] ss:$56 sps:$4 sm:$0xff]   ;;  %v1173_v32 = vld [vmem:[%s1703_s1 + $0x2ac] ss:$56 sps:$4 sm:$0xff]   ;;  %v1146_v34 = vld [vmem:[%s1703_s1 + $0x80] ss:$56 sps:$4 sm:$0xff]  }
   0xc   :  { %700 = vmatprep.subr.bf16.mxu0 %v1122_v7  ;;  %v1148_v33 = vld [vmem:[%s1703_s1 + $0x84] ss:$56 sps:$4 sm:$0xff]   ;;  %v1175_v35 = vld [vmem:[%s1703_s1 + $0x2a8] ss:$56 sps:$4 sm:$0xff]   ;;  %v1154_v37 = vld [vmem:[%s1703_s1 + $0xf4] ss:$56 sps:$4 sm:$0xff]  }
   0xd   :  { %v1179_v36 = vld [vmem:[%s1703_s1 + $0x31c] ss:$56 sps:$4 sm:$0xff]   ;;  %v1152_v38 = vld [vmem:[%s1703_s1 + $0xf0] ss:$56 sps:$4 sm:$0xff]   ;;  %v1158_v42 = vld [vmem:[%s1703_s1 + $0x160] ss:$56 sps:$4 sm:$0xff]  }
   0xe   :  { %740 = vmatpush1.bf16.msra.mxu1 %v1151_v18  ;;  %v1181_v39 = vld [vmem:[%s1703_s1 + $0x318] ss:$56 sps:$4 sm:$0xff]   ;;  %v1187_v40 = vld [vmem:[%s1703_s1 + $0x1c] ss:$56 sps:$4 sm:$0xff]   ;;  %v1193_v44 = vld [vmem:[%s1703_s1 + $0x8c] ss:$56 sps:$4 sm:$0xff]  }
   0xf   :  { %701 = vmatpush1.bf16.msra.mxu0 %v1124_v8  ;;  %741 = vmatprep.subr.bf16.mxu1 %v1155_v19  ;;  %v1160_v41 = vld [vmem:[%s1703_s1 + $0x164] ss:$56 sps:$4 sm:$0xff]   ;;  %v1185_v43 = vld [vmem:[%s1703_s1 + $0x18] ss:$56 sps:$4 sm:$0xff]   ;;  %v1166_v45 = vld [vmem:[%s1703_s1 + $0x1d4] ss:$56 sps:$4 sm:$0xff]  }
  0x10   :  { %702 = vmatprep.subr.bf16.mxu0 %v1125_v11  ;;  %v1164_v46 = vld [vmem:[%s1703_s1 + $0x1d0] ss:$56 sps:$4 sm:$0xff]   ;;  %v1199_v48 = vld [vmem:[%s1703_s1 + $0xfc] ss:$56 sps:$4 sm:$0xff]   ;;  %v1170_v50 = vld [vmem:[%s1703_s1 + $0x240] ss:$56 sps:$4 sm:$0xff]  }
  0x11   :  { %v1191_v47 = vld [vmem:[%s1703_s1 + $0x88] ss:$56 sps:$4 sm:$0xff]   ;;  %v1172_v49 = vld [vmem:[%s1703_s1 + $0x244] ss:$56 sps:$4 sm:$0xff]   ;;  %v1197_v51 = vld [vmem:[%s1703_s1 + $0xf8] ss:$56 sps:$4 sm:$0xff]  }
  0x12   :  { %742 = vmatpush1.bf16.msra.mxu1 %v1157_v22  ;;  %v1205_v52 = vld [vmem:[%s1703_s1 + $0x16c] ss:$56 sps:$4 sm:$0xff]   ;;  %v1176_v54 = vld [vmem:[%s1703_s1 + $0x2b0] ss:$56 sps:$4 sm:$0xff]   ;;  %v1211_v56 = vld [vmem:[%s1703_s1 + $0x1dc] ss:$56 sps:$4 sm:$0xff]  }
  0x13   :  { %703 = vmatpush1.bf16.msra.mxu0 %v1127_v14  ;;  %743 = vmatprep.subr.bf16.mxu1 %v1161_v23  ;;  %v1178_v53 = vld [vmem:[%s1703_s1 + $0x2b4] ss:$56 sps:$4 sm:$0xff]   ;;  %v1203_v55 = vld [vmem:[%s1703_s1 + $0x168] ss:$56 sps:$4 sm:$0xff]   ;;  %v1184_v57 = vld [vmem:[%s1703_s1 + $0x324] ss:$56 sps:$4 sm:$0xff]  }
  0x14   :  { %704 = vmatprep.subr.bf16.mxu0 %v1128_v15  ;;  %v1182_v58 = vld [vmem:[%s1703_s1 + $0x320] ss:$56 sps:$4 sm:$0xff]   ;;  %v1217_v60 = vld [vmem:[%s1703_s1 + $0x24c] ss:$56 sps:$4 sm:$0xff]   ;;  %v1223_v0 = vld [vmem:[%s1703_s1 + $0x2bc] ss:$56 sps:$4 sm:$0xff]  }
  0x15   :  { %v1209_v59 = vld [vmem:[%s1703_s1 + $0x1d8] ss:$56 sps:$4 sm:$0xff]   ;;  %v1190_v61 = vld [vmem:[%s1703_s1 + $0x24] ss:$56 sps:$4 sm:$0xff]   ;;  %v1215_v63 = vld [vmem:[%s1703_s1 + $0x248] ss:$56 sps:$4 sm:$0xff]  }
  0x16   :  { %744 = vmatpush1.bf16.msra.mxu1 %v1163_v26  ;;  %v1188_v62 = vld [vmem:[%s1703_s1 + $0x20] ss:$56 sps:$4 sm:$0xff]   ;;  %v1196_v2 = vld [vmem:[%s1703_s1 + $0x94] ss:$56 sps:$4 sm:$0xff]   ;;  %v1194_v3 = vld [vmem:[%s1703_s1 + $0x90] ss:$56 sps:$4 sm:$0xff]  }
  0x17   :  { %705 = vmatpush1.bf16.msra.mxu0 %v1130_v17  ;;  %745 = vmatprep.subr.bf16.mxu1 %v1167_v27  ;;  %v1221_v4 = vld [vmem:[%s1703_s1 + $0x2b8] ss:$56 sps:$4 sm:$0xff]   ;;  %v1229_v5 = vld [vmem:[%s1703_s1 + $0x32c] ss:$56 sps:$4 sm:$0xff]   ;;  %v1227_v9 = vld [vmem:[%s1703_s1 + $0x328] ss:$56 sps:$4 sm:$0xff]  }
  0x18   :  { %706 = vmatprep.subr.bf16.mxu0 %v1131_v20  ;;  %v1202_v6 = vld [vmem:[%s1703_s1 + $0x104] ss:$56 sps:$4 sm:$0xff]   ;;  %v1200_v7 = vld [vmem:[%s1703_s1 + $0x100] ss:$56 sps:$4 sm:$0xff]   ;;  %v1208_v11 = vld [vmem:[%s1703_s1 + $0x174] ss:$56 sps:$4 sm:$0xff]  }
  0x19   :  { %v128_v8 = vld [vmem:[%s1705_s2] sm:$0xff]  ;;  %v1206_v13 = vld [vmem:[%s1703_s1 + $0x170] ss:$56 sps:$4 sm:$0xff]   ;;  %v1241_v14 = vld [vmem:[%s1703_s1 + $0x9c] ss:$56 sps:$4 sm:$0xff]  }
  0x1a   :  { %746 = vmatpush1.bf16.msra.mxu1 %v1169_v31  ;;  %131 = vperm.xlu0 %1112, %v128_v8   ;;  %v1235_v10 = vld [vmem:[%s1703_s1 + $0x2c] ss:$56 sps:$4 sm:$0xff]   ;;  %v1233_v12 = vld [vmem:[%s1703_s1 + $0x28] ss:$56 sps:$4 sm:$0xff]   ;;  %v1239_v16 = vld [vmem:[%s1703_s1 + $0x98] ss:$56 sps:$4 sm:$0xff]  }
  0x1b   :  { %707 = vmatpush1.bf16.msra.mxu0 %v1133_v21  ;;  %747 = vmatprep.subr.bf16.mxu1 %v1173_v32  ;;  %v1214_v15 = vld [vmem:[%s1703_s1 + $0x1e4] ss:$56 sps:$4 sm:$0xff]   ;;  %v1212_v17 = vld [vmem:[%s1703_s1 + $0x1e0] ss:$56 sps:$4 sm:$0xff]   ;;  %v1220_v19 = vld [vmem:[%s1703_s1 + $0x254] ss:$56 sps:$4 sm:$0xff]  }
  0x1c   :  { %708 = vmatprep.subr.bf16.mxu0 %v1134_v24  ;;  %v1247_v18 = vld [vmem:[%s1703_s1 + $0x10c] ss:$56 sps:$4 sm:$0xff]   ;;  %v1245_v20 = vld [vmem:[%s1703_s1 + $0x108] ss:$56 sps:$4 sm:$0xff]   ;;  %v1253_v22 = vld [vmem:[%s1703_s1 + $0x17c] ss:$56 sps:$4 sm:$0xff]  }
  0x1d   :  { %v1218_v21 = vld [vmem:[%s1703_s1 + $0x250] ss:$56 sps:$4 sm:$0xff]   ;;  %v1226_v23 = vld [vmem:[%s1703_s1 + $0x2c4] ss:$56 sps:$4 sm:$0xff]   ;;  %v1232_v27 = vld [vmem:[%s1703_s1 + $0x334] ss:$56 sps:$4 sm:$0xff]  }
  0x1e   :  { %748 = vmatpush1.bf16.msra.mxu1 %v1175_v35  ;;  %v1251_v24 = vld [vmem:[%s1703_s1 + $0x178] ss:$56 sps:$4 sm:$0xff]   ;;  %v1259_v26 = vld [vmem:[%s1703_s1 + $0x1ec] ss:$56 sps:$4 sm:$0xff]   ;;  %v1265_v31 = vld [vmem:[%s1703_s1 + $0x25c] ss:$56 sps:$4 sm:$0xff]  }
  0x1f   :  { %709 = vmatpush1.bf16.msra.mxu0 %v1136_v25  ;;  %749 = vmatprep.subr.bf16.mxu1 %v1179_v36  ;;  %v1224_v25 = vld [vmem:[%s1703_s1 + $0x2c0] ss:$56 sps:$4 sm:$0xff]   ;;  %v1238_v32 = vld [vmem:[%s1703_s1 + $0x34] ss:$56 sps:$4 sm:$0xff]   ;;  %v1244_v36 = vld [vmem:[%s1703_s1 + $0xa4] ss:$56 sps:$4 sm:$0xff]  }
  0x20   :  { %776 = vmatprep.subr.bf16.mxu0 %v1142_v28  ;;  %v1257_v28 = vld [vmem:[%s1703_s1 + $0x1e8] ss:$56 sps:$4 sm:$0xff]   ;;  %v1271_v35 = vld [vmem:[%s1703_s1 + $0x2cc] ss:$56 sps:$4 sm:$0xff]  }
  0x22   :  { %727 = vmatmul.mubr.bf16.vlgmr.msra.gmra.mrb[0].mxu0 %v1392_v29  ;;  %750 = vmatpush1.bf16.msra.mxu1 %v1181_v39  ;;  %v1277_v39 = vld [vmem:[%s1703_s1 + $0x33c] ss:$56 sps:$4 sm:$0xff]  }
  0x23   :  { %777 = vmatpush1.bf16.msra.mxu0 %v1140_v30  ;;  %808 = vmatprep.mubr.bf16.mxu0 %v1281_v1  ;;  %v1230_v30 = vld [vmem:[%s1703_s1 + $0x330] ss:$56 sps:$4 sm:$0xff]  }
  0x24   :  { %778 = vmatprep.subr.bf16.mxu0 %v1148_v33  ;;  %817 = vmatprep.subr.bf16.mxu1 %v1187_v40  ;;  %v1263_v33 = vld [vmem:[%s1703_s1 + $0x258] ss:$56 sps:$4 sm:$0xff]   ;;  %v1250_v40 = vld [vmem:[%s1703_s1 + $0x114] ss:$56 sps:$4 sm:$0xff]  }
  0x25   :  { %768 = vmatmul.mubr.bf16.vlgmr.msra.gmra.mrb[0].mxu1 %v1392_v29 }
  0x26   :  { %818 = vmatpush1.bf16.msra.mxu1 %v1185_v43  ;;  %849 = vmatprep.mubr.bf16.mxu1 %v1281_v1  ;;  %v1256_v43 = vld [vmem:[%s1703_s1 + $0x184] ss:$56 sps:$4 sm:$0xff]  }
  0x27   :  { %779 = vmatpush1.bf16.msra.mxu0 %v1146_v34  ;;  %819 = vmatprep.subr.bf16.mxu1 %v1193_v44  ;;  %v1236_v34 = vld [vmem:[%s1703_s1 + $0x30] ss:$56 sps:$4 sm:$0xff]   ;;  %v1262_v44 = vld [vmem:[%s1703_s1 + $0x1f4] ss:$56 sps:$4 sm:$0xff]  }
  0x28   :  { %780 = vmatprep.subr.bf16.mxu0 %v1154_v37  ;;  %v1269_v37 = vld [vmem:[%s1703_s1 + $0x2c8] ss:$56 sps:$4 sm:$0xff]  }
  0x2a   :  { %820 = vmatpush1.bf16.msra.mxu1 %v1191_v47  ;;  %v1266_v47 = vld [vmem:[%s1703_s1 + $0x260] ss:$56 sps:$4 sm:$0xff]  }
  0x2b   :  { %781 = vmatpush1.bf16.msra.mxu0 %v1152_v38  ;;  %821 = vmatprep.subr.bf16.mxu1 %v1199_v48  ;;  %v1242_v38 = vld [vmem:[%s1703_s1 + $0xa0] ss:$56 sps:$4 sm:$0xff]   ;;  %v1274_v48 = vld [vmem:[%s1703_s1 + $0x2d4] ss:$56 sps:$4 sm:$0xff]  }
  0x2c   :  { %782 = vmatprep.subr.bf16.mxu0 %v1160_v41  ;;  %v1275_v41 = vld [vmem:[%s1703_s1 + $0x338] ss:$56 sps:$4 sm:$0xff]  }
  0x2e   :  { %822 = vmatpush1.bf16.msra.mxu1 %v1197_v51  ;;  %v1278_v51 = vld [vmem:[%s1703_s1 + $0x340] ss:$56 sps:$4 sm:$0xff]  }
  0x2f   :  { %783 = vmatpush1.bf16.msra.mxu0 %v1158_v42  ;;  %823 = vmatprep.subr.bf16.mxu1 %v1205_v52  ;;  %v1248_v42 = vld [vmem:[%s1703_s1 + $0x110] ss:$56 sps:$4 sm:$0xff]  }
  0x30   :  { %784 = vmatprep.subr.bf16.mxu0 %v1166_v45  ;;  %v1260_v45 = vld [vmem:[%s1703_s1 + $0x1f0] ss:$56 sps:$4 sm:$0xff]  }
  0x32   :  { %824 = vmatpush1.bf16.msra.mxu1 %v1203_v55 }
  0x33   :  { %785 = vmatpush1.bf16.msra.mxu0 %v1164_v46  ;;  %825 = vmatprep.subr.bf16.mxu1 %v1211_v56  ;;  %v1268_v46 = vld [vmem:[%s1703_s1 + $0x264] ss:$56 sps:$4 sm:$0xff]  }
  0x34   :  { %786 = vmatprep.subr.bf16.mxu0 %v1172_v49  ;;  %v1272_v49 = vld [vmem:[%s1703_s1 + $0x2d0] ss:$56 sps:$4 sm:$0xff]  }
  0x36   :  { %826 = vmatpush1.bf16.msra.mxu1 %v1209_v59 }
  0x37   :  { %787 = vmatpush1.bf16.msra.mxu0 %v1170_v50  ;;  %827 = vmatprep.subr.bf16.mxu1 %v1217_v60  ;;  %v1280_v50 = vld [vmem:[%s1703_s1 + $0x344] ss:$56 sps:$4 sm:$0xff]  }
  0x38   :  { %788 = vmatprep.subr.bf16.mxu0 %v1178_v53 }
  0x3a   :  { %828 = vmatpush1.bf16.msra.mxu1 %v1215_v63 }
  0x3b   :  { %789 = vmatpush1.bf16.msra.mxu0 %v1176_v54  ;;  %829 = vmatprep.subr.bf16.mxu1 %v1223_v0 }
  0x3c   :  { %790 = vmatprep.subr.bf16.mxu0 %v1184_v57 }
  0x3e   :  { %830 = vmatpush1.bf16.msra.mxu1 %v1221_v4 }
  0x3f   :  { %791 = vmatpush1.bf16.msra.mxu0 %v1182_v58  ;;  %831 = vmatprep.subr.bf16.mxu1 %v1229_v5 }
  0x40   :  { %858 = vmatprep.subr.bf16.mxu0 %v1190_v61 }
  0x42   :  { %809 = vmatmul.mubr.bf16.vlgmr.msra.gmra.mrb[4].mxu0 %v1392_v29  ;;  %832 = vmatpush1.bf16.msra.mxu1 %v1227_v9 }
  0x43   :  { %859 = vmatpush1.bf16.msra.mxu0 %v1188_v62  ;;  %890 = vmatprep.mubr.bf16.mxu0 %v1281_v1 }
  0x44   :  { %860 = vmatprep.subr.bf16.mxu0 %v1196_v2  ;;  %899 = vmatprep.subr.bf16.mxu1 %v1235_v10 }
  0x45   :  { %850 = vmatmul.mubr.bf16.vlgmr.msra.gmra.mrb[4].mxu1 %v1392_v29 }
  0x46   :  { %900 = vmatpush1.bf16.msra.mxu1 %v1233_v12  ;;  %931 = vmatprep.mubr.bf16.mxu1 %v1281_v1 }
  0x47   :  { %861 = vmatpush1.bf16.msra.mxu0 %v1194_v3  ;;  %901 = vmatprep.subr.bf16.mxu1 %v1241_v14 }
  0x48   :  { %862 = vmatprep.subr.bf16.mxu0 %v1202_v6 }
  0x4a   :  { %902 = vmatpush1.bf16.msra.mxu1 %v1239_v16 }
  0x4b   :  { %863 = vmatpush1.bf16.msra.mxu0 %v1200_v7  ;;  %903 = vmatprep.subr.bf16.mxu1 %v1247_v18 }
  0x4c   :  { %864 = vmatprep.subr.bf16.mxu0 %v1208_v11 }
  0x4e   :  { %904 = vmatpush1.bf16.msra.mxu1 %v1245_v20 }
  0x4f   :  { %865 = vmatpush1.bf16.msra.mxu0 %v1206_v13  ;;  %905 = vmatprep.subr.bf16.mxu1 %v1253_v22 }
  0x50   :  { %866 = vmatprep.subr.bf16.mxu0 %v1214_v15 }
  0x52   :  { %906 = vmatpush1.bf16.msra.mxu1 %v1251_v24 }
  0x53   :  { %867 = vmatpush1.bf16.msra.mxu0 %v1212_v17  ;;  %907 = vmatprep.subr.bf16.mxu1 %v1259_v26 }
  0x54   :  { %868 = vmatprep.subr.bf16.mxu0 %v1220_v19 }
  0x56   :  { %908 = vmatpush1.bf16.msra.mxu1 %v1257_v28 }
  0x57   :  { %869 = vmatpush1.bf16.msra.mxu0 %v1218_v21  ;;  %909 = vmatprep.subr.bf16.mxu1 %v1265_v31 }
  0x58   :  { %870 = vmatprep.subr.bf16.mxu0 %v1226_v23 }
  0x5a   :  { %910 = vmatpush1.bf16.msra.mxu1 %v1263_v33 }
  0x5b   :  { %871 = vmatpush1.bf16.msra.mxu0 %v1224_v25  ;;  %911 = vmatprep.subr.bf16.mxu1 %v1271_v35 }
  0x5c   :  { %872 = vmatprep.subr.bf16.mxu0 %v1232_v27 }
  0x5e   :  { %912 = vmatpush1.bf16.msra.mxu1 %v1269_v37 }
  0x5f   :  { %873 = vmatpush1.bf16.msra.mxu0 %v1230_v30  ;;  %913 = vmatprep.subr.bf16.mxu1 %v1277_v39 }
  0x60   :  { %940 = vmatprep.subr.bf16.mxu0 %v1238_v32 }
  0x62   :  { %891 = vmatmul.mubr.bf16.vlgmr.msra.gmra.mrb[8].mxu0 %v1392_v29  ;;  %914 = vmatpush1.bf16.msra.mxu1 %v1275_v41 }
  0x63   :  { %941 = vmatpush1.bf16.msra.mxu0 %v1236_v34  ;;  %972 = vmatprep.mubr.bf16.mxu0 %v1281_v1  ;;  %v1254_v1 = vld [vmem:[%s1703_s1 + $0x180] ss:$56 sps:$4 sm:$0xff]  }
  0x64   :  { %942 = vmatprep.subr.bf16.mxu0 %v1244_v36 }
  0x65   :  { %932 = vmatmul.mubr.bf16.vlgmr.msra.gmra.mrb[8].mxu1 %v1392_v29 }
  0x67   :  { %943 = vmatpush1.bf16.msra.mxu0 %v1242_v38 }
  0x68   :  { %944 = vmatprep.subr.bf16.mxu0 %v1250_v40 }
  0x6b   :  { %945 = vmatpush1.bf16.msra.mxu0 %v1248_v42 }
  0x6c   :  { %946 = vmatprep.subr.bf16.mxu0 %v1256_v43 }
  0x6f   :  { %947 = vmatpush1.bf16.msra.mxu0 %v1254_v1 }
  0x70   :  { %948 = vmatprep.subr.bf16.mxu0 %v1262_v44 }
  0x73   :  { %949 = vmatpush1.bf16.msra.mxu0 %v1260_v45 }
  0x74   :  { %950 = vmatprep.subr.bf16.mxu0 %v1268_v46 }
  0x77   :  { %951 = vmatpush1.bf16.msra.mxu0 %v1266_v47 }
  0x78   :  { %952 = vmatprep.subr.bf16.mxu0 %v1274_v48 }
  0x7b   :  { %953 = vmatpush1.bf16.msra.mxu0 %v1272_v49 }
  0x7c   :  { %954 = vmatprep.subr.bf16.mxu0 %v1280_v50 }
  0x7f   :  { %955 = vmatpush1.bf16.msra.mxu0 %v1278_v51 }
  0x82   :  { %973 = vmatmul.mubr.bf16.vlgmr.msra.gmra.mrb[12].mxu0 %v1392_v29 }
  0x99   :  { %v132_v52 = vpop.permute.xlu0 %131 }
  0xf5   :  { %v728_v53 = vpop.f32.mrb[0].mxu0 }
  0xf6   :  { %v729_v54 = vadd.f32 %v728_v53, %v132_v52  ;;  %v730_v55 = vpop.f32.mrb[1].mxu0 }
  0xf7   :  { %v731_v56 = vadd.f32 %v730_v55, %v132_v52  ;;  %v732_v57 = vpop.f32.mrb[2].mxu0 }
  0xf8   :  { %981 = vst [vmem:[%s1706_s3] sm:$0xff] %v729_v54  ;;  %v733_v58 = vpop.f32.mrb[3].mxu0  ;;  %v769_v59 = vpop.f32.mrb[0].mxu1 }
  0xf9   :  { %982 = vst [vmem:[%s1706_s3 + $0x8] sm:$0xff] %v731_v56  ;;  %v770_v60 = vadd.f32 %v769_v59, %v132_v52  ;;  %v771_v61 = vpop.f32.mrb[1].mxu1 }
  0xfa   :  { %v772_v62 = vadd.f32 %v771_v61, %v132_v52  ;;  %v773_v29 = vpop.f32.mrb[2].mxu1 }
  0xfb   :  { %983 = vst [vmem:[%s1706_s3 + $0x10] sm:$0xff] %v770_v60  ;;  %v774_v63 = vpop.f32.mrb[3].mxu1 }
  0xfc   :  { %984 = vst [vmem:[%s1706_s3 + $0x18] sm:$0xff] %v772_v62 }
 0x115   :  { %v810_v0 = vpop.f32.mrb[4].mxu0 }
 0x116   :  { %v811_v2 = vadd.f32 %v810_v0, %v132_v52  ;;  %v812_v3 = vpop.f32.mrb[5].mxu0 }
 0x117   :  { %v813_v4 = vadd.f32 %v812_v3, %v132_v52  ;;  %v814_v5 = vpop.f32.mrb[6].mxu0 }
 0x118   :  { %985 = vst [vmem:[%s1706_s3 + $0x20] sm:$0xff] %v811_v2  ;;  %v815_v6 = vpop.f32.mrb[7].mxu0  ;;  %v851_v7 = vpop.f32.mrb[4].mxu1 }
 0x119   :  { %986 = vst [vmem:[%s1706_s3 + $0x28] sm:$0xff] %v813_v4  ;;  %v852_v8 = vadd.f32 %v851_v7, %v132_v52  ;;  %v853_v9 = vpop.f32.mrb[5].mxu1 }
 0x11a   :  { %v854_v10 = vadd.f32 %v853_v9, %v132_v52  ;;  %v855_v11 = vpop.f32.mrb[6].mxu1 }
 0x11b   :  { %987 = vst [vmem:[%s1706_s3 + $0x30] sm:$0xff] %v852_v8  ;;  %v856_v12 = vpop.f32.mrb[7].mxu1 }
 0x11c   :  { %988 = vst [vmem:[%s1706_s3 + $0x38] sm:$0xff] %v854_v10 }
 0x135   :  { %v892_v13 = vpop.f32.mrb[8].mxu0 }
 0x136   :  { %v893_v14 = vadd.f32 %v892_v13, %v132_v52  ;;  %v894_v15 = vpop.f32.mrb[9].mxu0 }
 0x137   :  { %v895_v16 = vadd.f32 %v894_v15, %v132_v52  ;;  %v896_v17 = vpop.f32.mrb[10].mxu0 }
 0x138   :  { %989 = vst [vmem:[%s1706_s3 + $0x40] sm:$0xff] %v893_v14  ;;  %v897_v18 = vpop.f32.mrb[11].mxu0  ;;  %v933_v19 = vpop.f32.mrb[8].mxu1 }
 0x139   :  { %990 = vst [vmem:[%s1706_s3 + $0x48] sm:$0xff] %v895_v16  ;;  %v934_v20 = vadd.f32 %v933_v19, %v132_v52  ;;  %v935_v21 = vpop.f32.mrb[9].mxu1 }
 0x13a   :  { %v936_v22 = vadd.f32 %v935_v21, %v132_v52  ;;  %v937_v23 = vpop.f32.mrb[10].mxu1 }
 0x13b   :  { %991 = vst [vmem:[%s1706_s3 + $0x50] sm:$0xff] %v934_v20  ;;  %v938_v24 = vpop.f32.mrb[11].mxu1 }
 0x13c   :  { %992 = vst [vmem:[%s1706_s3 + $0x58] sm:$0xff] %v936_v22 }
 0x155   :  { %v974_v25 = vpop.f32.mrb[12].mxu0 }
 0x156   :  { %v975_v26 = vadd.f32 %v974_v25, %v132_v52  ;;  %v976_v27 = vpop.f32.mrb[13].mxu0 }
 0x157   :  { %v977_v28 = vadd.f32 %v976_v27, %v132_v52  ;;  %v978_v30 = vpop.f32.mrb[14].mxu0 }
 0x158   :  { %993 = vst [vmem:[%s1706_s3 + $0x60] sm:$0xff] %v975_v26  ;;  %v979_v31 = vpop.f32.mrb[15].mxu0 }
 0x159   :  { %994 = vst [vmem:[%s1706_s3 + $0x68] sm:$0xff] %v977_v28 }

</bundles_post_ra>
